<compile_context>
chip_gen: v6e
topology: v6e:2x2x1
jax: 0.10.0
libtpu: 0.0.40
codegen_flags: <defaults>
</compile_context>

<pallas_src>
import numpy as np
import jax
import jax.numpy as jnp
from jax import lax
from jax.experimental import pallas as pl
from jax.experimental.pallas import tpu as pltpu


def _round_up(x, m):
    return ((x + m - 1) // m) * m


# ---------------------------------------------------------------------------
# Static "module" construction (mirrors EmbeddingGenerator.__init__)
# ---------------------------------------------------------------------------
def build_embedding_generator(key, input_dim, cat_dims, cat_idxs, cat_emb_dim=None):
    if not cat_dims or not cat_idxs:
        return dict(skip_embedding=True, input_dim=input_dim, post_embed_dim=input_dim)

    if cat_emb_dim is None or (isinstance(cat_emb_dim, (list, tuple)) and len(cat_emb_dim) == 0):
        cat_emb_dim = [min(600, round(1.6 * n_cats ** 0.56)) for n_cats in cat_dims]
    if isinstance(cat_emb_dim, int):
        cat_emb_dims = [cat_emb_dim] * len(cat_idxs)
    else:
        cat_emb_dims = list(cat_emb_dim)
    if len(cat_emb_dims) != len(cat_dims):
        raise ValueError("cat_emb_dim and cat_dims must be lists of same length")

    post_embed_dim = int(input_dim + np.sum(cat_emb_dims) - len(cat_emb_dims))

    sorted_order = np.argsort(cat_idxs)
    cat_idxs_sorted = [int(cat_idxs[i]) for i in sorted_order]
    cat_dims_sorted = [int(cat_dims[i]) for i in sorted_order]
    emb_dims_sorted = [int(cat_emb_dims[i]) for i in sorted_order]

    # nn.Embedding default init ~ N(0, 1)
    tables = []
    for cat_dim, emb_dim in zip(cat_dims_sorted, emb_dims_sorted):
        key, sub = jax.random.split(key)
        tables.append(jax.random.normal(sub, (cat_dim, emb_dim), dtype=jnp.float32))

    # static output-column offset of every input feature
    cat_pos = {j: k for k, j in enumerate(cat_idxs_sorted)}
    offsets = []
    off = 0
    for j in range(input_dim):
        offsets.append(off)
        off += emb_dims_sorted[cat_pos[j]] if j in cat_pos else 1
    assert off == post_embed_dim

    return dict(
        skip_embedding=False,
        input_dim=input_dim,
        post_embed_dim=post_embed_dim,
        cat_idxs_sorted=cat_idxs_sorted,
        cat_dims_sorted=cat_dims_sorted,
        emb_dims_sorted=emb_dims_sorted,
        offsets=offsets,
        tables=tables,
        _op_cache={},          # prepared operands, amortized across forwards
    )


# ---------------------------------------------------------------------------
# Operand preparation (done once per weight update, cached)
# ---------------------------------------------------------------------------
def _prepare_operands(gen, p_pad, table_dtype):
    cache_key = (int(p_pad), jnp.dtype(table_dtype).name)
    cached = gen["_op_cache"].get(cache_key)
    if cached is not None:
        return cached

    input_dim = gen["input_dim"]
    cat_pos = {j: k for k, j in enumerate(gen["cat_idxs_sorted"])}

    # 0/1 placement matrix for continuous columns (f32, kept exact)
    cont_sel = np.zeros((input_dim, p_pad), np.float32)
    for j in range(input_dim):
        if j not in cat_pos:
            cont_sel[j, gen["offsets"][j]] = 1.0

    # All embedding tables stacked vertically, each placed at its static output
    # column offset -> a single fused (sum(cat_dims), p_pad) weight for one matmul.
    k_cat = int(np.sum(gen["cat_dims_sorted"]))
    w_cat = np.zeros((k_cat, p_pad), np.float32)
    cat_bases = []
    row = 0
    for k, j in enumerate(gen["cat_idxs_sorted"]):
        cdim = gen["cat_dims_sorted"][k]
        emb = gen["emb_dims_sorted"][k]
        off = gen["offsets"][j]
        w_cat[row:row + cdim, off:off + emb] = np.asarray(gen["tables"][k])
        cat_bases.append(row)
        row += cdim

    ops = (jnp.asarray(cont_sel, jnp.float32),
           jnp.asarray(w_cat).astype(table_dtype),
           tuple(cat_bases))
    gen["_op_cache"][cache_key] = ops
    return ops


# ---------------------------------------------------------------------------
# Pallas kernel
# ---------------------------------------------------------------------------
def _make_kernel(cat_cols, cat_dims, cat_bases, k_cat, n_cont, table_dtype):
    n_cat = len(cat_cols)

    def kernel(x_ref, cont_sel_ref, w_cat_ref, o_ref):
        x = x_ref[...].astype(jnp.float32)                         # (TB, D)
        tb, d = x.shape

        if n_cont > 0:
            # Continuous columns: exact placement matmul (0/1 weights, f32).
            # Zero the categorical-coded columns first so a NaN/Inf code cannot
            # leak through 0 * NaN into unrelated output columns.
            col = lax.broadcasted_iota(jnp.int32, (tb, d), 1)
            is_cat = col == cat_cols[0]
            for j in cat_cols[1:]:
                is_cat = jnp.logical_or(is_cat, col == j)
            x_cont = jnp.where(is_cat, 0.0, x)
            acc = jnp.dot(x_cont, cont_sel_ref[...],
                          preferred_element_type=jnp.float32)
        else:
            acc = jnp.zeros((tb, o_ref.shape[1]), jnp.float32)

        # Categorical columns: ONE fused one-hot @ stacked-tables matmul (bf16 in,
        # f32 accumulate). Codes are clamped into range; PyTorch's nn.Embedding
        # would raise an index error for out-of-range codes instead.
        giota = lax.broadcasted_iota(jnp.int32, (tb, k_cat), 1)
        hit = None
        for k in range(n_cat):
            j = cat_cols[k]
            code = x[:, j:j + 1].astype(jnp.int32)                 # (TB, 1)
            code = jnp.clip(code, 0, cat_dims[k] - 1)
            cmp = giota == (code + cat_bases[k])
            hit = cmp if hit is None else jnp.logical_or(hit, cmp)
        onehot = jnp.where(hit, 1.0, 0.0).astype(table_dtype)      # 0/1 exact in bf16
        acc = acc + jnp.dot(onehot, w_cat_ref[...],
                            preferred_element_type=jnp.float32)

        o_ref[...] = acc.astype(o_ref.dtype)

    return kernel


# ---------------------------------------------------------------------------
# Wrapper
# ---------------------------------------------------------------------------
def _vmem_bytes(batch_tile, d, p_pad, k_cat, table_bytes):
    params = d * p_pad * 4 + k_cat * p_pad * table_bytes             # single-buffered
    io = 2 * batch_tile * d * 4 + 2 * batch_tile * p_pad * 4         # x + out, double-buffered
    temps = batch_tile * (p_pad * 4 + k_cat * (4 + 2 + 2) + d * (4 + 4 + 4))
    return params + io + temps


def embedding_generator_forward(gen, x, *, batch_tile=None,
                                table_dtype=jnp.bfloat16, out_dtype=jnp.float32):
    if gen["skip_embedding"]:
        return x  # module is the identity in this configuration

    B, D = x.shape
    assert D == gen["input_dim"]
    P = gen["post_embed_dim"]
    # Lane-dense (unmasked) output stores: compute into a 128-multiple-wide tile.
    P_pad = _round_up(max(P, 128), 128)

    cont_sel, w_cat, cat_bases = _prepare_operands(gen, P_pad, table_dtype)
    K_cat = int(w_cat.shape[0])
    table_bytes = jnp.dtype(table_dtype).itemsize
    n_cont = D - len(gen["cat_idxs_sorted"])

    # --- batch tile: as large as fits a conservative VMEM budget (~40 MiB) ---
    budget = 40 * (1 << 20)
    if batch_tile is None:
        batch_tile = min(1024, _round_up(B, 8))
        while batch_tile > 128 and _vmem_bytes(batch_tile, D, P_pad, K_cat, table_bytes) > budget:
            batch_tile //= 2
    batch_tile = max(8, _round_up(int(batch_tile), 8))

    # Arbitrary B: zero-pad the batch to a tile multiple, slice back afterwards.
    B_pad = _round_up(B, batch_tile)
    x_in = x.astype(jnp.float32)
    if B_pad != B:
        x_in = jnp.pad(x_in, ((0, B_pad - B), (0, 0)))
    grid = (B_pad // batch_tile,)   # on v7x an even #steps balances the two TCs

    vmem_limit = int(min(64 * (1 << 20),
                         max(32 * (1 << 20),
                             2 * _vmem_bytes(batch_tile, D, P_pad, K_cat, table_bytes))))

    kernel = _make_kernel(tuple(gen["cat_idxs_sorted"]),
                          tuple(gen["cat_dims_sorted"]),
                          tuple(cat_bases), K_cat, n_cont, table_dtype)

    def _run(single_buffer_params):
        def param_spec(shape):
            if single_buffer_params:
                # grid-invariant parameters: single-buffered, VMEM-resident
                return pl.BlockSpec(shape, lambda b: (0, 0), pipeline_mode=pl.Buffered(1))
            return pl.BlockSpec(shape, lambda b: (0, 0))

        in_specs = [
            pl.BlockSpec((batch_tile, D), lambda b: (b, 0)),        # x tile
            param_spec((D, P_pad)),                                 # continuous placement
            param_spec((K_cat, P_pad)),                             # stacked tables
        ]
        out_specs = pl.BlockSpec((batch_tile, P_pad), lambda b: (b, 0))
        return pl.pallas_call(
            kernel,
            out_shape=jax.ShapeDtypeStruct((B_pad, P_pad), out_dtype),
            grid=grid,
            in_specs=in_specs,
            out_specs=out_specs,
            compiler_params=pltpu.CompilerParams(
                dimension_semantics=("parallel",),
                vmem_limit_bytes=vmem_limit,
            ),
        )(x_in, cont_sel, w_cat)

    try:
        out = _run(True)
    except Exception:                 # fallback for jax versions without pipeline_mode
        out = _run(False)

    return out[:B, :P]


# ---------------------------------------------------------------------------
# Pure-JAX reference (mirrors the PyTorch forward; uses the stored-dtype tables)
# ---------------------------------------------------------------------------
def ref_forward(gen, x, table_dtype=jnp.bfloat16):
    if gen["skip_embedding"]:
        return x
    cat_pos = {j: k for k, j in enumerate(gen["cat_idxs_sorted"])}
    cols = []
    for j in range(gen["input_dim"]):
        if j in cat_pos:
            k = cat_pos[j]
            table = gen["tables"][k].astype(table_dtype).astype(jnp.float32)
            idx = x[:, j].astype(jnp.int32)
            cols.append(table[idx])                              # (B, emb_dim_k)
        else:
            cols.append(x[:, j:j + 1].astype(jnp.float32))       # (B, 1)
    return jnp.concatenate(cols, axis=1)


if __name__ == "__main__":
    input_dim = 8
    cat_idxs = [6, 1, 4]          # deliberately unsorted: exercises the argsort path
    cat_dims = [11, 5, 7]         # default emb dims -> [6, 4, 5]; post_embed_dim = 20
    B = 16

    key = jax.random.PRNGKey(0)
    key, k_gen, k_x, k_i = jax.random.split(key, 4)
    gen = build_embedding_generator(k_gen, input_dim, cat_dims, cat_idxs)

    # continuous columns ~ N(0, 1); categorical columns hold integer codes (as floats)
    x = jax.random.normal(k_x, (B, input_dim), dtype=jnp.float32)
    for idx_col, n_mod in zip(cat_idxs, cat_dims):
        k_i, sub = jax.random.split(k_i)
        codes = jax.random.randint(sub, (B,), 0, n_mod)
        x = x.at[:, idx_col].set(codes.astype(jnp.float32))

    out = embedding_generator_forward(gen, x, batch_tile=8)   # 2 "parallel" grid steps
    out = jax.block_until_ready(out)

    ref = ref_forward(gen, x)
    assert out.shape == (B, gen["post_embed_dim"]), (out.shape, gen["post_embed_dim"])
    assert jnp.allclose(out, ref, atol=1e-5, rtol=1e-5), float(jnp.max(jnp.abs(out - ref)))

    print("KERNEL_OK")
</pallas_src>

<mosaic_0001>
module attributes {stable_mosaic.version = 11 : i64} {
  func.func @kernel(%arg0: i32, %arg1: memref<8x8xf32, #tpu.memory_space<vmem>>, %arg2: memref<8x128xf32, #tpu.memory_space<vmem>>, %arg3: memref<23x128xbf16, #tpu.memory_space<vmem>>, %arg4: memref<8x128xf32, #tpu.memory_space<vmem>>) attributes {dimension_semantics = [#tpu.dimension_semantics<parallel>], iteration_bounds = array<i64: 2>, scalar_prefetch = 0 : i64, scratch_operands = 0 : i64, tpu.core_type = #tpu.core_type<tc>, window_params = [{transform_indices = @transform_0, window_bounds = array<i64: 8, 8>}, {pipeline_mode = #tpu.pipeline_mode<synchronous>, transform_indices = @transform_1, window_bounds = array<i64: 8, 128>}, {pipeline_mode = #tpu.pipeline_mode<synchronous>, transform_indices = @transform_2, window_bounds = array<i64: 23, 128>}, {transform_indices = @transform_3, window_bounds = array<i64: 8, 128>}]} {
    %c0 = arith.constant 0 : index
    %c0_0 = arith.constant 0 : index
    %0 = vector.load %arg1[%c0, %c0_0] : memref<8x8xf32, #tpu.memory_space<vmem>>, vector<8x8xf32>
    %1 = tpu.iota {dimensions = array<i32: 1>} : vector<8x8xi32>
    %c1_i32 = arith.constant 1 : i32
    %2 = vector.broadcast %c1_i32 : i32 to vector<8x8xi32>
    %3 = arith.cmpi eq, %1, %2 : vector<8x8xi32>
    %c4_i32 = arith.constant 4 : i32
    %4 = vector.broadcast %c4_i32 : i32 to vector<8x8xi32>
    %5 = arith.cmpi eq, %1, %4 : vector<8x8xi32>
    %6 = arith.ori %3, %5 : vector<8x8xi1>
    %c6_i32 = arith.constant 6 : i32
    %7 = vector.broadcast %c6_i32 : i32 to vector<8x8xi32>
    %8 = arith.cmpi eq, %1, %7 : vector<8x8xi32>
    %9 = arith.ori %6, %8 : vector<8x8xi1>
    %cst = arith.constant 0.000000e+00 : f32
    %10 = vector.broadcast %cst : f32 to vector<8x8xf32>
    %11 = arith.select %9, %10, %0 : vector<8x8xi1>, vector<8x8xf32>
    %c0_1 = arith.constant 0 : index
    %c0_2 = arith.constant 0 : index
    %12 = vector.load %arg2[%c0_1, %c0_2] : memref<8x128xf32, #tpu.memory_space<vmem>>, vector<8x128xf32>
    %cst_3 = arith.constant dense<0.000000e+00> : vector<8x128xf32>
    %13 = tpu.matmul %11, %12, %cst_3 {dimension_numbers = #tpu.dot_dimension_numbers<[1], [0], [0], [1], [0, 0, 1, 1], [], []>} : vector<8x8xf32>, vector<8x128xf32>, vector<8x128xf32> -> vector<8x128xf32>
    %14 = tpu.iota {dimensions = array<i32: 1>} : vector<8x23xi32>
    %15 = vector.extract_strided_slice %0 {offsets = [0, 1], sizes = [8, 1], strides = [1, 1]} : vector<8x8xf32> to vector<8x1xf32>
    %16 = arith.fptosi %15 : vector<8x1xf32> to vector<8x1xi32>
    %c0_i32 = arith.constant 0 : i32
    %c4_i32_4 = arith.constant 4 : i32
    %17 = vector.broadcast %c0_i32 : i32 to vector<8x1xi32>
    %18 = arith.maxsi %17, %16 : vector<8x1xi32>
    %19 = vector.broadcast %c4_i32_4 : i32 to vector<8x1xi32>
    %20 = arith.minsi %19, %18 : vector<8x1xi32>
    %c0_i32_5 = arith.constant 0 : i32
    %21 = vector.broadcast %c0_i32_5 : i32 to vector<8x1xi32>
    %22 = arith.addi %20, %21 : vector<8x1xi32>
    %23 = vector.broadcast %22 : vector<8x1xi32> to vector<8x23xi32>
    %24 = arith.cmpi eq, %14, %23 : vector<8x23xi32>
    %25 = vector.extract_strided_slice %0 {offsets = [0, 4], sizes = [8, 1], strides = [1, 1]} : vector<8x8xf32> to vector<8x1xf32>
    %26 = arith.fptosi %25 : vector<8x1xf32> to vector<8x1xi32>
    %c0_i32_6 = arith.constant 0 : i32
    %c6_i32_7 = arith.constant 6 : i32
    %27 = vector.broadcast %c0_i32_6 : i32 to vector<8x1xi32>
    %28 = arith.maxsi %27, %26 : vector<8x1xi32>
    %29 = vector.broadcast %c6_i32_7 : i32 to vector<8x1xi32>
    %30 = arith.minsi %29, %28 : vector<8x1xi32>
    %c5_i32 = arith.constant 5 : i32
    %31 = vector.broadcast %c5_i32 : i32 to vector<8x1xi32>
    %32 = arith.addi %30, %31 : vector<8x1xi32>
    %33 = vector.broadcast %32 : vector<8x1xi32> to vector<8x23xi32>
    %34 = arith.cmpi eq, %14, %33 : vector<8x23xi32>
    %35 = arith.ori %24, %34 : vector<8x23xi1>
    %36 = vector.extract_strided_slice %0 {offsets = [0, 6], sizes = [8, 1], strides = [1, 1]} : vector<8x8xf32> to vector<8x1xf32>
    %37 = arith.fptosi %36 : vector<8x1xf32> to vector<8x1xi32>
    %c0_i32_8 = arith.constant 0 : i32
    %c10_i32 = arith.constant 10 : i32
    %38 = vector.broadcast %c0_i32_8 : i32 to vector<8x1xi32>
    %39 = arith.maxsi %38, %37 : vector<8x1xi32>
    %40 = vector.broadcast %c10_i32 : i32 to vector<8x1xi32>
    %41 = arith.minsi %40, %39 : vector<8x1xi32>
    %c12_i32 = arith.constant 12 : i32
    %42 = vector.broadcast %c12_i32 : i32 to vector<8x1xi32>
    %43 = arith.addi %41, %42 : vector<8x1xi32>
    %44 = vector.broadcast %43 : vector<8x1xi32> to vector<8x23xi32>
    %45 = arith.cmpi eq, %14, %44 : vector<8x23xi32>
    %46 = arith.ori %35, %45 : vector<8x23xi1>
    %cst_9 = arith.constant 1.000000e+00 : f32
    %cst_10 = arith.constant 0.000000e+00 : f32
    %47 = vector.broadcast %cst_9 : f32 to vector<8x23xf32>
    %48 = vector.broadcast %cst_10 : f32 to vector<8x23xf32>
    %49 = arith.select %46, %47, %48 : vector<8x23xi1>, vector<8x23xf32>
    %50 = arith.truncf %49 : vector<8x23xf32> to vector<8x23xbf16>
    %c0_11 = arith.constant 0 : index
    %c0_12 = arith.constant 0 : index
    %51 = vector.load %arg3[%c0_11, %c0_12] : memref<23x128xbf16, #tpu.memory_space<vmem>>, vector<23x128xbf16>
    %cst_13 = arith.constant dense<0.000000e+00> : vector<8x128xf32>
    %52 = tpu.matmul %50, %51, %cst_13 {dimension_numbers = #tpu.dot_dimension_numbers<[1], [0], [0], [1], [0, 0, 1, 1], [], []>} : vector<8x23xbf16>, vector<23x128xbf16>, vector<8x128xf32> -> vector<8x128xf32>
    %53 = arith.addf %13, %52 : vector<8x128xf32>
    %c0_14 = arith.constant 0 : index
    %c0_15 = arith.constant 0 : index
    %54 = vector.load %arg4[%c0_14, %c0_15] : memref<8x128xf32, #tpu.memory_space<vmem>>, vector<8x128xf32>
    tpu.vector_store %arg4[%c0_14, %c0_15], %53 {strides = array<i32>} : memref<8x128xf32, #tpu.memory_space<vmem>>, vector<8x128xf32>,
    return
  }
  func.func @transform_0(%arg0: i32) -> (i32, i32) {
    %c0_i32 = arith.constant 0 : i32
    %c0_i32_0 = arith.constant 0 : i32
    return %arg0, %c0_i32 : i32, i32
  }
  func.func @transform_1(%arg0: i32) -> (i32, i32) {
    %c0_i32 = arith.constant 0 : i32
    %c0_i32_0 = arith.constant 0 : i32
    %c0_i32_1 = arith.constant 0 : i32
    return %c0_i32, %c0_i32_0 : i32, i32
  }
  func.func @transform_2(%arg0: i32) -> (i32, i32) {
    %c0_i32 = arith.constant 0 : i32
    %c0_i32_0 = arith.constant 0 : i32
    %c0_i32_1 = arith.constant 0 : i32
    return %c0_i32, %c0_i32_0 : i32, i32
  }
  func.func @transform_3(%arg0: i32) -> (i32, i32) {
    %c0_i32 = arith.constant 0 : i32
    %c0_i32_0 = arith.constant 0 : i32
    return %arg0, %c0_i32 : i32, i32
  }
}

module attributes {stable_mosaic.version = 11 : i64} {
  func.func @kernel(%arg0: i32, %arg1: memref<8x8xf32, #tpu.memory_space<vmem>>, %arg2: memref<8x128xf32, #tpu.memory_space<vmem>>, %arg3: memref<23x128xbf16, #tpu.memory_space<vmem>>, %arg4: memref<8x128xf32, #tpu.memory_space<vmem>>) attributes {dimension_semantics = [#tpu.dimension_semantics<parallel>], iteration_bounds = array<i64: 2>, scalar_prefetch = 0 : i64, scratch_operands = 0 : i64, tpu.core_type = #tpu.core_type<tc>, window_params = [{transform_indices = @transform_0, window_bounds = array<i64: 8, 8>}, {pipeline_mode = #tpu.pipeline_mode<synchronous>, transform_indices = @transform_1, window_bounds = array<i64: 8, 128>}, {pipeline_mode = #tpu.pipeline_mode<synchronous>, transform_indices = @transform_2, window_bounds = array<i64: 23, 128>}, {transform_indices = @transform_3, window_bounds = array<i64: 8, 128>}]} {
    %c0 = arith.constant 0 : index
    %c0_0 = arith.constant 0 : index
    %0 = vector.load %arg1[%c0, %c0_0] : memref<8x8xf32, #tpu.memory_space<vmem>>, vector<8x8xf32>
    %1 = tpu.iota {dimensions = array<i32: 1>} : vector<8x8xi32>
    %c1_i32 = arith.constant 1 : i32
    %2 = vector.broadcast %c1_i32 : i32 to vector<8x8xi32>
    %3 = arith.cmpi eq, %1, %2 : vector<8x8xi32>
    %c4_i32 = arith.constant 4 : i32
    %4 = vector.broadcast %c4_i32 : i32 to vector<8x8xi32>
    %5 = arith.cmpi eq, %1, %4 : vector<8x8xi32>
    %6 = arith.ori %3, %5 : vector<8x8xi1>
    %c6_i32 = arith.constant 6 : i32
    %7 = vector.broadcast %c6_i32 : i32 to vector<8x8xi32>
    %8 = arith.cmpi eq, %1, %7 : vector<8x8xi32>
    %9 = arith.ori %6, %8 : vector<8x8xi1>
    %cst = arith.constant 0.000000e+00 : f32
    %10 = vector.broadcast %cst : f32 to vector<8x8xf32>
    %11 = arith.select %9, %10, %0 : vector<8x8xi1>, vector<8x8xf32>
    %c0_1 = arith.constant 0 : index
    %c0_2 = arith.constant 0 : index
    %12 = vector.load %arg2[%c0_1, %c0_2] : memref<8x128xf32, #tpu.memory_space<vmem>>, vector<8x128xf32>
    %cst_3 = arith.constant dense<0.000000e+00> : vector<8x128xf32>
    %13 = tpu.matmul %11, %12, %cst_3 {dimension_numbers = #tpu.dot_dimension_numbers<[1], [0], [0], [1], [0, 0, 1, 1], [], []>} : vector<8x8xf32>, vector<8x128xf32>, vector<8x128xf32> -> vector<8x128xf32>
    %14 = tpu.iota {dimensions = array<i32: 1>} : vector<8x23xi32>
    %15 = vector.extract_strided_slice %0 {offsets = [0, 1], sizes = [8, 1], strides = [1, 1]} : vector<8x8xf32> to vector<8x1xf32>
    %16 = arith.fptosi %15 : vector<8x1xf32> to vector<8x1xi32>
    %c0_i32 = arith.constant 0 : i32
    %c4_i32_4 = arith.constant 4 : i32
    %17 = vector.broadcast %c0_i32 : i32 to vector<8x1xi32>
    %18 = arith.maxsi %17, %16 : vector<8x1xi32>
    %19 = vector.broadcast %c4_i32_4 : i32 to vector<8x1xi32>
    %20 = arith.minsi %19, %18 : vector<8x1xi32>
    %c0_i32_5 = arith.constant 0 : i32
    %21 = vector.broadcast %c0_i32_5 : i32 to vector<8x1xi32>
    %22 = arith.addi %20, %21 : vector<8x1xi32>
    %23 = vector.broadcast %22 : vector<8x1xi32> to vector<8x23xi32>
    %24 = arith.cmpi eq, %14, %23 : vector<8x23xi32>
    %25 = vector.extract_strided_slice %0 {offsets = [0, 4], sizes = [8, 1], strides = [1, 1]} : vector<8x8xf32> to vector<8x1xf32>
    %26 = arith.fptosi %25 : vector<8x1xf32> to vector<8x1xi32>
    %c0_i32_6 = arith.constant 0 : i32
    %c6_i32_7 = arith.constant 6 : i32
    %27 = vector.broadcast %c0_i32_6 : i32 to vector<8x1xi32>
    %28 = arith.maxsi %27, %26 : vector<8x1xi32>
    %29 = vector.broadcast %c6_i32_7 : i32 to vector<8x1xi32>
    %30 = arith.minsi %29, %28 : vector<8x1xi32>
    %c5_i32 = arith.constant 5 : i32
    %31 = vector.broadcast %c5_i32 : i32 to vector<8x1xi32>
    %32 = arith.addi %30, %31 : vector<8x1xi32>
    %33 = vector.broadcast %32 : vector<8x1xi32> to vector<8x23xi32>
    %34 = arith.cmpi eq, %14, %33 : vector<8x23xi32>
    %35 = arith.ori %24, %34 : vector<8x23xi1>
    %36 = vector.extract_strided_slice %0 {offsets = [0, 6], sizes = [8, 1], strides = [1, 1]} : vector<8x8xf32> to vector<8x1xf32>
    %37 = arith.fptosi %36 : vector<8x1xf32> to vector<8x1xi32>
    %c0_i32_8 = arith.constant 0 : i32
    %c10_i32 = arith.constant 10 : i32
    %38 = vector.broadcast %c0_i32_8 : i32 to vector<8x1xi32>
    %39 = arith.maxsi %38, %37 : vector<8x1xi32>
    %40 = vector.broadcast %c10_i32 : i32 to vector<8x1xi32>
    %41 = arith.minsi %40, %39 : vector<8x1xi32>
    %c12_i32 = arith.constant 12 : i32
    %42 = vector.broadcast %c12_i32 : i32 to vector<8x1xi32>
    %43 = arith.addi %41, %42 : vector<8x1xi32>
    %44 = vector.broadcast %43 : vector<8x1xi32> to vector<8x23xi32>
    %45 = arith.cmpi eq, %14, %44 : vector<8x23xi32>
    %46 = arith.ori %35, %45 : vector<8x23xi1>
    %cst_9 = arith.constant 1.000000e+00 : f32
    %cst_10 = arith.constant 0.000000e+00 : f32
    %47 = vector.broadcast %cst_9 : f32 to vector<8x23xf32>
    %48 = vector.broadcast %cst_10 : f32 to vector<8x23xf32>
    %49 = arith.select %46, %47, %48 : vector<8x23xi1>, vector<8x23xf32>
    %50 = arith.truncf %49 : vector<8x23xf32> to vector<8x23xbf16>
    %c0_11 = arith.constant 0 : index
    %c0_12 = arith.constant 0 : index
    %51 = vector.load %arg3[%c0_11, %c0_12] : memref<23x128xbf16, #tpu.memory_space<vmem>>, vector<23x128xbf16>
    %cst_13 = arith.constant dense<0.000000e+00> : vector<8x128xf32>
    %52 = tpu.matmul %50, %51, %cst_13 {dimension_numbers = #tpu.dot_dimension_numbers<[1], [0], [0], [1], [0, 0, 1, 1], [], []>} : vector<8x23xbf16>, vector<23x128xbf16>, vector<8x128xf32> -> vector<8x128xf32>
    %53 = arith.addf %13, %52 : vector<8x128xf32>
    %c0_14 = arith.constant 0 : index
    %c0_15 = arith.constant 0 : index
    %54 = vector.load %arg4[%c0_14, %c0_15] : memref<8x128xf32, #tpu.memory_space<vmem>>, vector<8x128xf32>
    tpu.vector_store %arg4[%c0_14, %c0_15], %53 {strides = array<i32>} : memref<8x128xf32, #tpu.memory_space<vmem>>, vector<8x128xf32>,
    return
  }
  func.func @transform_0(%arg0: i32) -> (i32, i32) {
    %c0_i32 = arith.constant 0 : i32
    %c0_i32_0 = arith.constant 0 : i32
    return %arg0, %c0_i32 : i32, i32
  }
  func.func @transform_1(%arg0: i32) -> (i32, i32) {
    %c0_i32 = arith.constant 0 : i32
    %c0_i32_0 = arith.constant 0 : i32
    %c0_i32_1 = arith.constant 0 : i32
    return %c0_i32, %c0_i32_0 : i32, i32
  }
  func.func @transform_2(%arg0: i32) -> (i32, i32) {
    %c0_i32 = arith.constant 0 : i32
    %c0_i32_0 = arith.constant 0 : i32
    %c0_i32_1 = arith.constant 0 : i32
    return %c0_i32, %c0_i32_0 : i32, i32
  }
  func.func @transform_3(%arg0: i32) -> (i32, i32) {
    %c0_i32 = arith.constant 0 : i32
    %c0_i32_0 = arith.constant 0 : i32
    return %arg0, %c0_i32 : i32, i32
  }
}

</mosaic_0001>

<bundles_post_ra>
// kernel: tpu_custom_call.1
= control target key start
LH: loop header
LB: loop body
LE: loop exit
PB: predicated region body
PF: predicated region fallthrough
CT: control target
= control target key end

     0   :  { %8 = vsyncpa [#allocation3], 0  ;;  %s697_s0 = inlined_call_operand.vmem [shape: f32[16,8], index: 0, kind: input, shape index: {}]   ;;  %s698_s1 = inlined_call_operand.vmem [shape: f32[8,128], index: 1, kind: input, shape index: {}]   ;;  %s699_s2 = inlined_call_operand.vmem [shape: bf16[23,128], index: 2, kind: input, shape index: {}]   ;;  %s700_s3 = inlined_call_operand.hbm [shape: f32[16,128], index: 3, kind: output, shape index: {}]  }
   0x1   :  { %10 = vsyncpa [#allocation3 + $0x1], 0  ;;  %s589_s12 = smov 0   ;;  %s591_s13 = smov 0  }
   0x2   :  { %s593_s14 = smov 0   ;;  %s595_s15 = smov 0  }
   0x3 LB: > { %s610_s16 = sadd.s32 4294967295, %s560_s15   ;;  %s415_s17 = sadd.s32 4294967294, %s560_s15   ;;  %s560_s15 = sphi %s595_s15, %s706_s15   ;;  %s556_s14 = sphi %s593_s14, %s705_s14   ;;  %s552_s13 = sphi %s591_s13, %s704_s13   ;;  %s548_s12 = sphi %s589_s12, %s703_s12  }
   0x4   : > { %s614_s18 = sadd.s32 1, %s560_s15   ;;  %s91_s19 = sadd.s32 1, %s556_s14 }
   0x5   : > { %s88_s20 = ssub.s32 %s560_s15, %s614_s18  ;;  %p101_p0 = scmp.ne.s32.totalorder %s556_s14, %s552_s13 }
   0x6   : > { %p89_p1 = scmp.eq.s32.totalorder %s88_s20, 0  ;;  %p102_p2 = scmp.eq.s32.totalorder %s610_s16, 1 }
   0x7   : > { %p107_p3 = scmp.ne.s32.totalorder %s552_s13, %s548_s12  ;;  %p108_p4 = scmp.eq.s32.totalorder %s415_s17, 1 }
   0x8   : > { %s625_s21 = scalar_select %p89_p1, %s556_s14, %s91_s19  }
   0x9   : > { %p627_p5 = por %p102_p2, %p101_p0  ;;  %p631_p6 = por %p108_p4, %p107_p3 }
   0xa   : > { %p418_p7 = scmp.ge.s32.totalorder %s560_s15, 1  ;;  %p139_p8 = scmp.lt.s32.totalorder %s560_s15, 3 }
   0xc   : > { %p140_p9 = pnand %p418_p7, %p139_p8 }
   0xd   : > { %p162_p10 = scmp.lt.s32.totalorder (!%p140_p9), %s610_s16, 1  ;;  %s159_s8 = sand.u32 (!%p140_p9), 1, %s552_s13  }
   0xe   : > { %143 = sbr.rel (%p140_p9) target bundleno = 376 (0x178), region = 32  ;;  %s419_s9 = sshll.u32 (!%p140_p9), %s159_s8, 3 }
   0xf   : > { %s426_s10 = sshll.u32 (!%p140_p9), %s610_s16, 7  ;;  %s161_s11 = scalar_lea.vmem (!%p140_p9), [#allocation2], %s419_s9 }
  0x10   : > { %s356_s17 = sshll.u32 (!%p140_p9), %s161_s11, 4  ;;  %s658_s17 = int_to_ptr.vmem [resolvable:$true] %s356_s17 }
  0x11   : > { %s500_s26 = scalar_lea.vmem (!%p140_p9), %s658_s17, 128 }
  0x12   : > { %p501_p11 = scmp.ne.s32.totalorder (!%p140_p9), %s658_s17, %s500_s26 }
  0x13   : > { %v562_v0 = vmov 1   ;;  %v563_v1 = vmov 6   ;;  %s163_s24 = scalar_select %p162_p10, %s610_s16, 1  ;;  %vm220_vm0 = vcmask 1042432   ;;  %v498_v5 = vld [vmem:[%s699_s2 + $0x8] ss:$0 sps:$4 sm:$0xff]   ;;  %v168_v9 = vlaneseq }
  0x14   : > { %494 = vset.pattern.permute.xlu0 %v562_v0  ;;  %496 = vset.pattern.permute.xlu1 %v563_v1  ;;  %vm221_vm2 = vcmask 1043456   ;;  %v564_v6 = vmov 65535   ;;  %v565_v10 = vmov 0.0   ;;  %v499_v19 = vld [vmem:[%s699_s2] sm:$0xff]   ;;  %v566_v20 = vmov 4   ;;  %p502_p12 = pnand %p501_p11, %p627_p5  ;;  %s568_s16 = smov [#allocation2]  }
  0x15   : > { %s420_s25 = sshll.u32 %s163_s24, 3  ;;  %v222_v7 = vsel %vm220_vm0, 4294967295, %v564_v6  ;;  %434 = vmatprep.subr.bf16.mxu0 %v565_v10  ;;  %442 = vmatprep.subr.mxu1 %v565_v10  ;;  %v169_v18 = vand.u32 127, %v168_v9  ;;  %v176_v21 = vld [vmem:[%s698_s1] sm:$0xff]  ;;  %vm567_vm11 = vmmov 0   ;;  %vm267_vm12 = vcmask 64512   ;;  %s656_s24 = scalar_lea.hbm %s700_s3, %s426_s10 }
  0x16   : > { %s165_s28 = scalar_lea.vmem %s697_s0, %s420_s25  ;;  %v223_v11 = vsel %vm221_vm2, %v222_v7, 0  ;;  %438 = vmatprep.mubr.msk.bf16.mxu0 %vm567_vm11, %v565_v10  ;;  %443 = vmatpush3.msra.mxu1 %v176_v21  ;;  %vm216_vm2 = vcmask 187392   ;;  %s343_s25 = scalar_lea.sflag [#allocation3], %s159_s8 }
  0x17   : > { %v167_v2 = vld [vmem:[%s165_s28] sm:$0xff]  ;;  %v225_v12 = vand.u32 %v498_v5, %v223_v11  ;;  %vm170_vm6 = vcmp.eq.s32.totalorder %v169_v18, 1  ;;  %vm171_vm7 = vcmp.eq.s32.totalorder %v169_v18, 4  ;;  %vm173_vm9 = vcmp.eq.s32.totalorder %v169_v18, 6  ;;  %444 = vmatprep.mubr.msk.f32.mxu1 %vm567_vm11, %v565_v10  ;;  %p503_p13 = pneg %p502_p12  ;;  %s504_s27 = sshll.u32 %s568_s16, 4  ;;  %s505_s27 = int_to_ptr.vmem [resolvable:$false] %s504_s27 }
  0x18   : > { %v447_v3 = vtrunc.f32 %v167_v2  ;;  %vm172_vm8 = vmor %vm170_vm6, %vm171_vm7  ;;  %s506_s28 = scalar_lea.vmem %s505_s27, 256  ;;  %p507_p0 = scmp.lt.s32.totalorder %s658_s17, %s505_s27 }
  0x19   : > { %435 = vmatpush3.bf16.msra.mxu0 %v225_v12  ;;  %vm174_vm10 = vmor %vm172_vm8, %vm173_vm9  ;;  %p508_p1 = scmp.lt.s32.totalorder %s506_s28, %s500_s26 }
  0x1a   : > { %v448_v4 = vcvt.f32.s32 %v447_v3  ;;  %436 = vmatprep.subr.bf16.mxu0 %v565_v10  ;;  %v175_v22 = vsel %vm174_vm10, 0.0, %v167_v2 }
  0x1b   : > { %445 = vmatmul.mubr.msk.f32.vlgmr.msra.gmra.mxu1 %vm267_vm12, %v175_v22  ;;  %p509_p2 = por %p508_p1, %p507_p0 }
  0x1c   : > { %vm178_vm1 = vcmp.gt.s32.totalorder %v448_v4, 0 }
  0x1d   : > { %v179_v8 = vsel %vm178_vm1, %v448_v4, 0  ;;  %437 = vmatpush3.bf16.msra.mxu0 %v499_v19  ;;  %p510_p3 = pnand %p509_p2, %p503_p13 }
  0x1e   : > { %vm180_vm3 = vcmp.lt.s32.totalorder %v179_v8, 4  ;;  %vm186_vm4 = vcmp.lt.s32.totalorder %v179_v8, 6  ;;  %vm194_vm5 = vcmp.lt.s32.totalorder %v179_v8, 10 }
  0x1f   : > { %v181_v13 = vsel %vm180_vm3, %v179_v8, 4  ;;  %v187_v14 = vsel %vm186_vm4, %v179_v8, 6  ;;  %v195_v15 = vsel %vm194_vm5, %v179_v8, 10 }
  0x20   : > { %183 = vperm.xlu0 %494, %v181_v13   ;;  %v196_v16 = vadd.s32 12, %v195_v15  ;;  %v188_v17 = vadd.s32 5, %v187_v14 }
  0x22   : > { %198 = vperm.xlu1 %496, %v196_v16  }
  0x24   : > { %495 = vset.pattern.permute.xlu0 %v566_v20 }
  0x25   : > { %190 = vperm.xlu0 %495, %v188_v17  }
  0x29   : > { %497 = vset.pattern.permute.xlu0 %v563_v1 }
  0x9b   : > { %v184_v23 = vpop.permute.xlu0 %183 }
  0x9c   : > { %vm185_vm14 = vcmp.eq.s32.totalorder %v169_v18, %v184_v23 }
  0x9d   : > { %v199_v24 = vpop.permute.xlu1 %198 }
  0x9e   : > { %vm200_vm13 = vcmp.eq.s32.totalorder %v169_v18, %v199_v24 }
  0xa0   : > { %v191_v25 = vpop.permute.xlu0 %190 }
  0xa1   : > { %vm192_vm15 = vcmp.eq.s32.totalorder %v169_v18, %v191_v25 }
  0xa2   : > { %vm193_vm0 = vmor %vm185_vm14, %vm192_vm15 }
  0xa3   : > { %vm201_vm1 = vmor %vm193_vm0, %vm200_vm13 }
  0xa4   : > { %v202_v26 = vsel %vm201_vm1, 1.0, %v565_v10 }
  0xa5   : > { %v203_v27 = vpack.c.bf16 %v202_v26, %v202_v26 }
  0xa7   : > { %439 = vmatmul.mubr.msk.bf16.vlgmr.msra.gmra.mxu0 %vm216_vm2, %v203_v27 }
  0xdb   : > { %v337_v28 = vpop.f32.mrf.mxu1 }
  0xdd   : > { %v446_v29 = vpop.f32.mrf.mxu1 }
 0x167   : > { %v261_v30 = vpop.f32.mrf.mxu0 }
 0x168   : > { %v338_v31 = vadd.f32 %v337_v28, %v261_v30 }
 0x169   : > { %v440_v32 = vpop.f32.mrf.mxu0 }
 0x16a   : > { %341 = vst [vmem:[%s161_s11] sm:$0xff] %v338_v31 }
 0x16b   : > { %v264_v33 = vpop.f32.mrf.mxu0 }
 0x16c   : > { %513 = shalt.err (!%p510_p3)
}
 0x16d   : > { %s514_s29 = scalar_lea.hbm %s656_s24, 128  ;;  %s518_s5 = scalar_lea.hbm %s700_s3, 256 }
 0x16e   : > { %p515_p4 = scmp.ne.s32.totalorder %s656_s24, %s514_s29  ;;  %p519_p9 = scmp.lt.s32.totalorder %s656_s24, %s700_s3 }
 0x16f   : > { %p520_p10 = scmp.lt.s32.totalorder %s518_s5, %s514_s29 }
 0x170   : > { %p516_p7 = pnand %p515_p4, %p627_p5 }
 0x171   : > { %p521_p11 = por %p520_p10, %p519_p9 }
 0x172   : > { %p517_p8 = pneg %p516_p7 }
 0x174   : > { %p522_p12 = pnand %p521_p11, %p517_p8 }
 0x176   : > { %525 = shalt.err (!%p522_p12)
}
 0x177   : > { %449 = dma.vmem_to_hbm [thread:$0]  (%p627_p5), %s658_s17, 128, %s656_s24, %s343_s25   ;;  %v441_v34 = vpop.f32.mrf.mxu0 }
 0x178 PF: > { %p455_p13 = scmp.ge.s32.totalorder %s560_s15, 2  ;;  %s368_s8 = sand.u32 1, %s548_s12  }
 0x179   : > { %s369_s9 = scalar_lea.sflag [#allocation3], %s368_s8 }
 0x17a   : > { %p452_p0 = pnand %p455_p13, %p631_p6 }
 0x17c   : > { %p453_p1 = pneg %p452_p0 }
 0x17e   : > { %543 = dma.done.wait (%p453_p1), %s369_s9, 128  }
 0x17f   : > { %545 = vsyncadd (%p453_p1), %s369_s9, 4294967168  ;;  %p13_p2 = scmp.ge.s32.totalorder %s614_s18, 4   ;;  %s703_s12 = smov %s552_s13 }
 0x180   : > { %s704_s13 = smov %s556_s14  ;;  %s705_s14 = smov %s625_s21 }
 0x181   : > { %s706_s15 = smov %s614_s18  ;;  %15 = sbr.rel (!%p13_p2) target bundleno = 3 (0x3), region = 67 }
 0x186   :  { %374 = vsyncpa [#allocation3], 1 }
 0x187   :  { %376 = vsyncpa [#allocation3 + $0x1], 1 }

// kernel: tpu_custom_call.1
= control target key start
LH: loop header
LB: loop body
LE: loop exit
PB: predicated region body
PF: predicated region fallthrough
CT: control target
= control target key end

     0   :  { %8 = vsyncpa [#allocation3], 0  ;;  %s697_s0 = inlined_call_operand.vmem [shape: f32[16,8], index: 0, kind: input, shape index: {}]   ;;  %s698_s1 = inlined_call_operand.vmem [shape: f32[8,128], index: 1, kind: input, shape index: {}]   ;;  %s699_s2 = inlined_call_operand.vmem [shape: bf16[23,128], index: 2, kind: input, shape index: {}]   ;;  %s700_s3 = inlined_call_operand.hbm [shape: f32[16,128], index: 3, kind: output, shape index: {}]  }
   0x1   :  { %10 = vsyncpa [#allocation3 + $0x1], 0  ;;  %s589_s12 = smov 0   ;;  %s591_s13 = smov 0  }
   0x2   :  { %s593_s14 = smov 0   ;;  %s595_s15 = smov 0  }
   0x3 LB: > { %s610_s16 = sadd.s32 4294967295, %s560_s15   ;;  %s415_s17 = sadd.s32 4294967294, %s560_s15   ;;  %s560_s15 = sphi %s595_s15, %s706_s15   ;;  %s556_s14 = sphi %s593_s14, %s705_s14   ;;  %s552_s13 = sphi %s591_s13, %s704_s13   ;;  %s548_s12 = sphi %s589_s12, %s703_s12  }
   0x4   : > { %s614_s18 = sadd.s32 1, %s560_s15   ;;  %s91_s19 = sadd.s32 1, %s556_s14 }
   0x5   : > { %s88_s20 = ssub.s32 %s560_s15, %s614_s18  ;;  %p101_p0 = scmp.ne.s32.totalorder %s556_s14, %s552_s13 }
   0x6   : > { %p89_p1 = scmp.eq.s32.totalorder %s88_s20, 0  ;;  %p102_p2 = scmp.eq.s32.totalorder %s610_s16, 1 }
   0x7   : > { %p107_p3 = scmp.ne.s32.totalorder %s552_s13, %s548_s12  ;;  %p108_p4 = scmp.eq.s32.totalorder %s415_s17, 1 }
   0x8   : > { %s625_s21 = scalar_select %p89_p1, %s556_s14, %s91_s19  }
   0x9   : > { %p627_p5 = por %p102_p2, %p101_p0  ;;  %p631_p6 = por %p108_p4, %p107_p3 }
   0xa   : > { %p418_p7 = scmp.ge.s32.totalorder %s560_s15, 1  ;;  %p139_p8 = scmp.lt.s32.totalorder %s560_s15, 3 }
   0xc   : > { %p140_p9 = pnand %p418_p7, %p139_p8 }
   0xd   : > { %p162_p10 = scmp.lt.s32.totalorder (!%p140_p9), %s610_s16, 1  ;;  %s159_s8 = sand.u32 (!%p140_p9), 1, %s552_s13  }
   0xe   : > { %143 = sbr.rel (%p140_p9) target bundleno = 376 (0x178), region = 32  ;;  %s419_s9 = sshll.u32 (!%p140_p9), %s159_s8, 3 }
   0xf   : > { %s426_s10 = sshll.u32 (!%p140_p9), %s610_s16, 7  ;;  %s161_s11 = scalar_lea.vmem (!%p140_p9), [#allocation2], %s419_s9 }
  0x10   : > { %s356_s17 = sshll.u32 (!%p140_p9), %s161_s11, 4  ;;  %s658_s17 = int_to_ptr.vmem [resolvable:$true] %s356_s17 }
  0x11   : > { %s500_s26 = scalar_lea.vmem (!%p140_p9), %s658_s17, 128 }
  0x12   : > { %p501_p11 = scmp.ne.s32.totalorder (!%p140_p9), %s658_s17, %s500_s26 }
  0x13   : > { %v562_v0 = vmov 1   ;;  %v563_v1 = vmov 6   ;;  %s163_s24 = scalar_select %p162_p10, %s610_s16, 1  ;;  %vm220_vm0 = vcmask 1042432   ;;  %v498_v5 = vld [vmem:[%s699_s2 + $0x8] ss:$0 sps:$4 sm:$0xff]   ;;  %v168_v9 = vlaneseq }
  0x14   : > { %494 = vset.pattern.permute.xlu0 %v562_v0  ;;  %496 = vset.pattern.permute.xlu1 %v563_v1  ;;  %vm221_vm2 = vcmask 1043456   ;;  %v564_v6 = vmov 65535   ;;  %v565_v10 = vmov 0.0   ;;  %v499_v19 = vld [vmem:[%s699_s2] sm:$0xff]   ;;  %v566_v20 = vmov 4   ;;  %p502_p12 = pnand %p501_p11, %p627_p5  ;;  %s568_s16 = smov [#allocation2]  }
  0x15   : > { %s420_s25 = sshll.u32 %s163_s24, 3  ;;  %v222_v7 = vsel %vm220_vm0, 4294967295, %v564_v6  ;;  %434 = vmatprep.subr.bf16.mxu0 %v565_v10  ;;  %442 = vmatprep.subr.mxu1 %v565_v10  ;;  %v169_v18 = vand.u32 127, %v168_v9  ;;  %v176_v21 = vld [vmem:[%s698_s1] sm:$0xff]  ;;  %vm567_vm11 = vmmov 0   ;;  %vm267_vm12 = vcmask 64512   ;;  %s656_s24 = scalar_lea.hbm %s700_s3, %s426_s10 }
  0x16   : > { %s165_s28 = scalar_lea.vmem %s697_s0, %s420_s25  ;;  %v223_v11 = vsel %vm221_vm2, %v222_v7, 0  ;;  %438 = vmatprep.mubr.msk.bf16.mxu0 %vm567_vm11, %v565_v10  ;;  %443 = vmatpush3.msra.mxu1 %v176_v21  ;;  %vm216_vm2 = vcmask 187392   ;;  %s343_s25 = scalar_lea.sflag [#allocation3], %s159_s8 }
  0x17   : > { %v167_v2 = vld [vmem:[%s165_s28] sm:$0xff]  ;;  %v225_v12 = vand.u32 %v498_v5, %v223_v11  ;;  %vm170_vm6 = vcmp.eq.s32.totalorder %v169_v18, 1  ;;  %vm171_vm7 = vcmp.eq.s32.totalorder %v169_v18, 4  ;;  %vm173_vm9 = vcmp.eq.s32.totalorder %v169_v18, 6  ;;  %444 = vmatprep.mubr.msk.f32.mxu1 %vm567_vm11, %v565_v10  ;;  %p503_p13 = pneg %p502_p12  ;;  %s504_s27 = sshll.u32 %s568_s16, 4  ;;  %s505_s27 = int_to_ptr.vmem [resolvable:$false] %s504_s27 }
  0x18   : > { %v447_v3 = vtrunc.f32 %v167_v2  ;;  %vm172_vm8 = vmor %vm170_vm6, %vm171_vm7  ;;  %s506_s28 = scalar_lea.vmem %s505_s27, 256  ;;  %p507_p0 = scmp.lt.s32.totalorder %s658_s17, %s505_s27 }
  0x19   : > { %435 = vmatpush3.bf16.msra.mxu0 %v225_v12  ;;  %vm174_vm10 = vmor %vm172_vm8, %vm173_vm9  ;;  %p508_p1 = scmp.lt.s32.totalorder %s506_s28, %s500_s26 }
  0x1a   : > { %v448_v4 = vcvt.f32.s32 %v447_v3  ;;  %436 = vmatprep.subr.bf16.mxu0 %v565_v10  ;;  %v175_v22 = vsel %vm174_vm10, 0.0, %v167_v2 }
  0x1b   : > { %445 = vmatmul.mubr.msk.f32.vlgmr.msra.gmra.mxu1 %vm267_vm12, %v175_v22  ;;  %p509_p2 = por %p508_p1, %p507_p0 }
  0x1c   : > { %vm178_vm1 = vcmp.gt.s32.totalorder %v448_v4, 0 }
  0x1d   : > { %v179_v8 = vsel %vm178_vm1, %v448_v4, 0  ;;  %437 = vmatpush3.bf16.msra.mxu0 %v499_v19  ;;  %p510_p3 = pnand %p509_p2, %p503_p13 }
  0x1e   : > { %vm180_vm3 = vcmp.lt.s32.totalorder %v179_v8, 4  ;;  %vm186_vm4 = vcmp.lt.s32.totalorder %v179_v8, 6  ;;  %vm194_vm5 = vcmp.lt.s32.totalorder %v179_v8, 10 }
  0x1f   : > { %v181_v13 = vsel %vm180_vm3, %v179_v8, 4  ;;  %v187_v14 = vsel %vm186_vm4, %v179_v8, 6  ;;  %v195_v15 = vsel %vm194_vm5, %v179_v8, 10 }
  0x20   : > { %183 = vperm.xlu0 %494, %v181_v13   ;;  %v196_v16 = vadd.s32 12, %v195_v15  ;;  %v188_v17 = vadd.s32 5, %v187_v14 }
  0x22   : > { %198 = vperm.xlu1 %496, %v196_v16  }
  0x24   : > { %495 = vset.pattern.permute.xlu0 %v566_v20 }
  0x25   : > { %190 = vperm.xlu0 %495, %v188_v17  }
  0x29   : > { %497 = vset.pattern.permute.xlu0 %v563_v1 }
  0x9b   : > { %v184_v23 = vpop.permute.xlu0 %183 }
  0x9c   : > { %vm185_vm14 = vcmp.eq.s32.totalorder %v169_v18, %v184_v23 }
  0x9d   : > { %v199_v24 = vpop.permute.xlu1 %198 }
  0x9e   : > { %vm200_vm13 = vcmp.eq.s32.totalorder %v169_v18, %v199_v24 }
  0xa0   : > { %v191_v25 = vpop.permute.xlu0 %190 }
  0xa1   : > { %vm192_vm15 = vcmp.eq.s32.totalorder %v169_v18, %v191_v25 }
  0xa2   : > { %vm193_vm0 = vmor %vm185_vm14, %vm192_vm15 }
  0xa3   : > { %vm201_vm1 = vmor %vm193_vm0, %vm200_vm13 }
  0xa4   : > { %v202_v26 = vsel %vm201_vm1, 1.0, %v565_v10 }
  0xa5   : > { %v203_v27 = vpack.c.bf16 %v202_v26, %v202_v26 }
  0xa7   : > { %439 = vmatmul.mubr.msk.bf16.vlgmr.msra.gmra.mxu0 %vm216_vm2, %v203_v27 }
  0xdb   : > { %v337_v28 = vpop.f32.mrf.mxu1 }
  0xdd   : > { %v446_v29 = vpop.f32.mrf.mxu1 }
 0x167   : > { %v261_v30 = vpop.f32.mrf.mxu0 }
 0x168   : > { %v338_v31 = vadd.f32 %v337_v28, %v261_v30 }
 0x169   : > { %v440_v32 = vpop.f32.mrf.mxu0 }
 0x16a   : > { %341 = vst [vmem:[%s161_s11] sm:$0xff] %v338_v31 }
 0x16b   : > { %v264_v33 = vpop.f32.mrf.mxu0 }
 0x16c   : > { %513 = shalt.err (!%p510_p3)
}
 0x16d   : > { %s514_s29 = scalar_lea.hbm %s656_s24, 128  ;;  %s518_s5 = scalar_lea.hbm %s700_s3, 256 }
 0x16e   : > { %p515_p4 = scmp.ne.s32.totalorder %s656_s24, %s514_s29  ;;  %p519_p9 = scmp.lt.s32.totalorder %s656_s24, %s700_s3 }
 0x16f   : > { %p520_p10 = scmp.lt.s32.totalorder %s518_s5, %s514_s29 }
 0x170   : > { %p516_p7 = pnand %p515_p4, %p627_p5 }
 0x171   : > { %p521_p11 = por %p520_p10, %p519_p9 }
 0x172   : > { %p517_p8 = pneg %p516_p7 }
 0x174   : > { %p522_p12 = pnand %p521_p11, %p517_p8 }
 0x176   : > { %525 = shalt.err (!%p522_p12)
}
 0x177   : > { %449 = dma.vmem_to_hbm [thread:$0]  (%p627_p5), %s658_s17, 128, %s656_s24, %s343_s25   ;;  %v441_v34 = vpop.f32.mrf.mxu0 }
 0x178 PF: > { %p455_p13 = scmp.ge.s32.totalorder %s560_s15, 2  ;;  %s368_s8 = sand.u32 1, %s548_s12  }
 0x179   : > { %s369_s9 = scalar_lea.sflag [#allocation3], %s368_s8 }
 0x17a   : > { %p452_p0 = pnand %p455_p13, %p631_p6 }
 0x17c   : > { %p453_p1 = pneg %p452_p0 }
 0x17e   : > { %543 = dma.done.wait (%p453_p1), %s369_s9, 128  }
 0x17f   : > { %545 = vsyncadd (%p453_p1), %s369_s9, 4294967168  ;;  %p13_p2 = scmp.ge.s32.totalorder %s614_s18, 4   ;;  %s703_s12 = smov %s552_s13 }
 0x180   : > { %s704_s13 = smov %s556_s14  ;;  %s705_s14 = smov %s625_s21 }
 0x181   : > { %s706_s15 = smov %s614_s18  ;;  %15 = sbr.rel (!%p13_p2) target bundleno = 3 (0x3), region = 67 }
 0x186   :  { %374 = vsyncpa [#allocation3], 1 }
 0x187   :  { %376 = vsyncpa [#allocation3 + $0x1], 1 }

</bundles_post_ra>
